<compile_context>
chip_gen: v6e
topology: v6e:2x2x1
jax: 0.10.0
libtpu: 0.0.40
codegen_flags: <defaults>
</compile_context>

<pallas_src>
import functools

import jax
import jax.numpy as jnp
from jax import lax
from jax.experimental import pallas as pl
from jax.experimental.pallas import tpu as pltpu

TOL = 1e-10
LANES = 128
SUBLANES = 8
MAX_ROW_TILE = 4096          # rows per DMA block (f32: 2 MiB per input block)
SUB_ROWS = 512               # rows per in-kernel compute chunk (f32: 256 KiB temps)


def _tensorcores_per_device():
    """2 TensorCores only on v7x; v5e/v6e expose a single TC per device."""
    try:
        kind = jax.devices()[0].device_kind.lower()
    except Exception:  # pragma: no cover - defensive
        return 1
    return 2 if ("v7" in kind or "7x" in kind) else 1


def _logmse_kernel(p_ref, a_ref, out_ref, *, tol, rows, row_tile, sub_rows,
                   n_inner, n_blocks, ragged, clamped):
    c = pl.program_id(0)     # TensorCore shard (parallel axis)
    i = pl.program_id(1)     # reduction step   (arbitrary axis)

    @pl.when(i == 0)
    def _init():
        out_ref[...] = jnp.zeros_like(out_ref)

    blk = c * n_inner + i
    n_sub = row_tile // sub_rows

    def accum_block(mask_rows):
        def body(s, acc):
            r0 = pl.multiple_of(s * sub_rows, sub_rows)
            p = jnp.maximum(p_ref[pl.ds(r0, sub_rows), :].astype(jnp.float32),
                            0.0) + tol
            a = jnp.maximum(a_ref[pl.ds(r0, sub_rows), :].astype(jnp.float32),
                            0.0) + tol
            # One EUP log per element instead of two: log(p) - log(a) == log(p/a).
            d = jnp.log(p / a)
            sq = d * d
            if mask_rows:
                grow = (blk * row_tile + r0
                        + lax.broadcasted_iota(jnp.int32, (sub_rows, LANES), 0))
                # Select (NOT multiply): stale rows in the ragged block may be NaN/Inf.
                sq = jnp.where(grow < rows, sq, 0.0)
            # vreg-shaped accumulation: cross-vreg VPU adds only, no per-step XLU reduce.
            return acc + jnp.sum(
                sq.reshape(sub_rows // SUBLANES, SUBLANES, LANES), axis=0)

        return lax.fori_loop(0, n_sub, body,
                             jnp.zeros((SUBLANES, LANES), jnp.float32))

    if not (ragged or clamped):
        # Common aligned case: zero masking / gating overhead.
        out_ref[...] += accum_block(False)
    else:
        is_last = blk == n_blocks - 1
        if ragged:
            full_cond = jnp.logical_not(is_last)
            if clamped:
                full_cond = jnp.logical_and(full_cond, blk < n_blocks)

            @pl.when(full_cond)
            def _full():
                out_ref[...] += accum_block(False)

            @pl.when(is_last)
            def _last():
                out_ref[...] += accum_block(True)
        else:
            # Only clamped duplicate blocks possible: skip their compute entirely.
            @pl.when(blk < n_blocks)
            def _valid():
                out_ref[...] += accum_block(False)


def log_mse_loss(pred, actual, tol=TOL):
    assert pred.shape == actual.shape
    n_elems = pred.size

    p_flat = pred.reshape(-1)
    a_flat = actual.reshape(-1)

    # Alignment quantum = native packed sublane tile of the narrowest input dtype
    # (8 rows f32, 16 rows bf16, 32 rows int8) x 128 lanes.
    itemsize = min(p_flat.dtype.itemsize, a_flat.dtype.itemsize)
    row_quantum = max(SUBLANES, SUBLANES * (4 // max(itemsize, 1)))
    chunk = row_quantum * LANES

    tail = n_elems % chunk
    n_main = n_elems - tail

    tail_sum = jnp.float32(0.0)
    if tail:
        # Tiny (< chunk elements) remainder in plain jnp; avoids full-array pad copies.
        pt = jnp.maximum(p_flat[n_main:].astype(jnp.float32), 0.0) + tol
        at = jnp.maximum(a_flat[n_main:].astype(jnp.float32), 0.0) + tol
        dt = jnp.log(pt / at)
        tail_sum = jnp.sum(dt * dt)

    if n_main == 0:
        return (tail_sum / n_elems).astype(jnp.float32)

    rows = n_main // LANES                     # multiple of row_quantum
    p2d = p_flat[:n_main].reshape(rows, LANES)
    a2d = a_flat[:n_main].reshape(rows, LANES)

    row_tile = min(MAX_ROW_TILE, rows)
    sub_rows = SUB_ROWS if row_tile % SUB_ROWS == 0 else row_tile
    n_blocks = -(-rows // row_tile)
    ragged = rows != n_blocks * row_tile

    ncores = _tensorcores_per_device() if n_blocks >= 2 else 1
    n_inner = -(-n_blocks // ncores)
    clamped = ncores * n_inner > n_blocks

    if clamped:
        in_map = lambda c, i: (jnp.minimum(c * n_inner + i, n_blocks - 1), 0)
    else:
        in_map = lambda c, i: (c * n_inner + i, 0)

    kernel = functools.partial(
        _logmse_kernel, tol=tol, rows=rows, row_tile=row_tile, sub_rows=sub_rows,
        n_inner=n_inner, n_blocks=n_blocks, ragged=ragged, clamped=clamped)

    bytes_in = n_main * (p2d.dtype.itemsize + a2d.dtype.itemsize)
    partials = pl.pallas_call(
        kernel,
        out_shape=jax.ShapeDtypeStruct((ncores * SUBLANES, LANES), jnp.float32),
        grid_spec=pltpu.PrefetchScalarGridSpec(
            num_scalar_prefetch=0,
            grid=(ncores, n_inner),
            in_specs=[
                pl.BlockSpec((row_tile, LANES), in_map),
                pl.BlockSpec((row_tile, LANES), in_map),
            ],
            out_specs=pl.BlockSpec((SUBLANES, LANES), lambda c, i: (c, 0)),
        ),
        compiler_params=pltpu.CompilerParams(
            dimension_semantics=("parallel", "arbitrary"),
            vmem_limit_bytes=32 * 1024 * 1024,
        ),
        cost_estimate=pl.CostEstimate(
            flops=7 * n_main,
            transcendentals=n_main,
            bytes_accessed=bytes_in + ncores * SUBLANES * LANES * 4,
        ),
    )(p2d, a2d)

    return ((jnp.sum(partials) + tail_sum) / n_elems).astype(jnp.float32)


def _reference(pred, actual, tol=TOL):
    p = jnp.log(jnp.maximum(pred, 0.0) + tol)
    a = jnp.log(jnp.maximum(actual, 0.0) + tol)
    return jnp.mean((p - a) ** 2)


if __name__ == "__main__":
    key = jax.random.PRNGKey(0)
    k1, k2 = jax.random.split(key)
    # NCHW inputs, small shapes
    pred = jax.random.normal(k1, (2, 4, 16, 16), dtype=jnp.float32)
    actual = jax.random.normal(k2, (2, 4, 16, 16), dtype=jnp.float32)

    out = log_mse_loss(pred, actual)
    out = jax.block_until_ready(out)

    ref = _reference(pred, actual)
    assert jnp.allclose(out, ref, rtol=2e-5, atol=1e-5), (out, ref)
    print("KERNEL_OK")
</pallas_src>

<mosaic_0001>
module attributes {stable_mosaic.version = 11 : i64} {
  func.func @_logmse_kernel(%arg0: i32, %arg1: i32, %arg2: memref<16x128xf32, #tpu.memory_space<vmem>>, %arg3: memref<16x128xf32, #tpu.memory_space<vmem>>, %arg4: memref<8x128xf32, #tpu.memory_space<vmem>>) attributes {dimension_semantics = [#tpu.dimension_semantics<parallel>, #tpu.dimension_semantics<arbitrary>], iteration_bounds = array<i64: 1, 1>, scalar_prefetch = 0 : i64, scratch_operands = 0 : i64, tpu.core_type = #tpu.core_type<tc>, window_params = [{transform_indices = @transform_0, window_bounds = array<i64: 16, 128>}, {transform_indices = @transform_1, window_bounds = array<i64: 16, 128>}, {transform_indices = @transform_2, window_bounds = array<i64: 8, 128>}]} {
    %c0_i32 = arith.constant 0 : i32
    %0 = arith.cmpi eq, %arg1, %c0_i32 : i32
    %1 = arith.extui %0 : i1 to i32
    %c0_i32_0 = arith.constant 0 : i32
    %2 = arith.cmpi ne, %1, %c0_i32_0 : i32
    scf.if %2 {
      %cst_12 = arith.constant 0.000000e+00 : f32
      %27 = vector.broadcast %cst_12 : f32 to vector<8x128xf32>
      %c0_13 = arith.constant 0 : index
      %c0_14 = arith.constant 0 : index
      %28 = vector.load %arg4[%c0_13, %c0_14] : memref<8x128xf32, #tpu.memory_space<vmem>>, vector<8x128xf32>
      tpu.vector_store %arg4[%c0_13, %c0_14], %27 {strides = array<i32>} : memref<8x128xf32, #tpu.memory_space<vmem>>, vector<8x128xf32>,
    } else {
    }
    %c0 = arith.constant 0 : index
    %c0_1 = arith.constant 0 : index
    %3 = vector.load %arg4[%c0, %c0_1] : memref<8x128xf32, #tpu.memory_space<vmem>>, vector<8x128xf32>
    %cst = arith.constant 0.000000e+00 : f32
    %4 = vector.broadcast %cst : f32 to vector<8x128xf32>
    %c0_i32_2 = arith.constant 0 : i32
    %c16_i32 = arith.constant 16 : i32
    %5 = arith.muli %c0_i32_2, %c16_i32 : i32
    %6 = tpu.assume_multiple %5, 16 : i32
    %7 = arith.index_cast %6 : i32 to index
    %c0_3 = arith.constant 0 : index
    %8 = vector.load %arg2[%7, %c0_3] : memref<16x128xf32, #tpu.memory_space<vmem>>, vector<16x128xf32>
    %cst_4 = arith.constant 0.000000e+00 : f32
    %9 = vector.broadcast %cst_4 : f32 to vector<16x128xf32>
    %10 = arith.maximumf %8, %9 : vector<16x128xf32>
    %cst_5 = arith.constant 1.000000e-10 : f32
    %11 = vector.broadcast %cst_5 : f32 to vector<16x128xf32>
    %12 = arith.addf %10, %11 : vector<16x128xf32>
    %13 = arith.index_cast %6 : i32 to index
    %c0_6 = arith.constant 0 : index
    %14 = vector.load %arg3[%13, %c0_6] : memref<16x128xf32, #tpu.memory_space<vmem>>, vector<16x128xf32>
    %cst_7 = arith.constant 0.000000e+00 : f32
    %15 = vector.broadcast %cst_7 : f32 to vector<16x128xf32>
    %16 = arith.maximumf %14, %15 : vector<16x128xf32>
    %cst_8 = arith.constant 1.000000e-10 : f32
    %17 = vector.broadcast %cst_8 : f32 to vector<16x128xf32>
    %18 = arith.addf %16, %17 : vector<16x128xf32>
    %19 = arith.divf %12, %18 : vector<16x128xf32>
    %20 = math.log %19 : vector<16x128xf32>
    %21 = arith.mulf %20, %20 : vector<16x128xf32>
    %22 = vector.shape_cast %21 : vector<16x128xf32> to vector<2x8x128xf32>
    %cst_9 = arith.constant dense<0.000000e+00> : vector<8x128xf32>
    %23 = vector.multi_reduction <add>, %22, %cst_9 [0] : vector<2x8x128xf32> to vector<8x128xf32>
    %24 = arith.addf %4, %23 : vector<8x128xf32>
    %c1_i32 = arith.constant 1 : i32
    %25 = arith.addf %3, %24 : vector<8x128xf32>
    %c0_10 = arith.constant 0 : index
    %c0_11 = arith.constant 0 : index
    %26 = vector.load %arg4[%c0_10, %c0_11] : memref<8x128xf32, #tpu.memory_space<vmem>>, vector<8x128xf32>
    tpu.vector_store %arg4[%c0_10, %c0_11], %25 {strides = array<i32>} : memref<8x128xf32, #tpu.memory_space<vmem>>, vector<8x128xf32>,
    return
  }
  func.func @transform_0(%arg0: i32, %arg1: i32) -> (i32, i32) {
    %c1_i32 = arith.constant 1 : i32
    %0 = arith.muli %arg0, %c1_i32 : i32
    %1 = arith.addi %0, %arg1 : i32
    %c0_i32 = arith.constant 0 : i32
    %c0_i32_0 = arith.constant 0 : i32
    return %1, %c0_i32 : i32, i32
  }
  func.func @transform_1(%arg0: i32, %arg1: i32) -> (i32, i32) {
    %c1_i32 = arith.constant 1 : i32
    %0 = arith.muli %arg0, %c1_i32 : i32
    %1 = arith.addi %0, %arg1 : i32
    %c0_i32 = arith.constant 0 : i32
    %c0_i32_0 = arith.constant 0 : i32
    return %1, %c0_i32 : i32, i32
  }
  func.func @transform_2(%arg0: i32, %arg1: i32) -> (i32, i32) {
    %c0_i32 = arith.constant 0 : i32
    %c0_i32_0 = arith.constant 0 : i32
    return %arg0, %c0_i32 : i32, i32
  }
}

</mosaic_0001>

<bundles_post_ra>
// kernel: tpu_custom_call.1
= control target key start
LH: loop header
LB: loop body
LE: loop exit
PB: predicated region body
PF: predicated region fallthrough
CT: control target
= control target key end

     0   :  { %7 = vsyncpa [#allocation3], 0  ;;  %s209_s0 = inlined_call_operand.hbm [shape: f32[16,128], index: 0, kind: input, shape index: {}]   ;;  %s210_s1 = inlined_call_operand.hbm [shape: f32[16,128], index: 1, kind: input, shape index: {}]   ;;  %s211_s2 = inlined_call_operand.hbm [shape: f32[8,128], index: 2, kind: output, shape index: {}]  }
   0x1   :  { %8 = vsyncpa [#allocation6], 0 }
   0x2   :  { %9 = vsyncpa [#allocation4], 0  ;;  %s180_s9 = smov [#allocation2]  }
   0x3   :  { %s19_s10 = sshll.u32 %s180_s9, 4  ;;  %s20_s10 = int_to_ptr.vmem [resolvable:$true] %s19_s10 }
   0x4   :  { %s122_s11 = scalar_lea.vmem %s20_s10, 256  ;;  %p127_p1 = scmp.lt.s32.totalorder %s20_s10, %s20_s10 }
   0x5   :  { %p123_p0 = scmp.ne.s32.totalorder %s20_s10, %s122_s11  ;;  %p128_p2 = scmp.lt.s32.totalorder %s122_s11, %s122_s11 }
   0x7   :  { %p129_p3 = por %p128_p2, %p127_p1 }
   0x9   :  { %p130_p4 = pnand %p129_p3, %p123_p0 }
   0xb   :  { %133 = shalt.err (!%p130_p4)
}
   0xc   :  { %s181_s12 = smov 128   ;;  %s182_s13 = smov 8  }
   0xd   :  { %25 = dma.hbm_to_vmem [thread:$0]  %s209_s0, 256, %s20_s10, [#allocation3], %s181_s12, %s181_s12, %s182_s13  }
   0xe   :  { %s183_s16 = smov [#allocation5]  }
   0xf   :  { %s35_s17 = sshll.u32 %s183_s16, 4  ;;  %s36_s17 = int_to_ptr.vmem [resolvable:$true] %s35_s17 }
  0x10   :  { %s142_s18 = scalar_lea.vmem %s36_s17, 256  ;;  %p147_p6 = scmp.lt.s32.totalorder %s36_s17, %s36_s17 }
  0x11   :  { %p143_p5 = scmp.ne.s32.totalorder %s36_s17, %s142_s18  ;;  %p148_p7 = scmp.lt.s32.totalorder %s142_s18, %s142_s18 }
  0x13   :  { %p149_p8 = por %p148_p7, %p147_p6 }
  0x15   :  { %p150_p9 = pnand %p149_p8, %p143_p5 }
  0x17   :  { %153 = shalt.err (!%p150_p9)
}
  0x18   :  { %41 = dma.hbm_to_vmem [thread:$0]  %s210_s1, 256, %s36_s17, [#allocation6], %s181_s12, %s181_s12, %s182_s13  }
  0x19   :  { %174 = dma.done.wait [#allocation3], 256  }
  0x1a   :  { %175 = vsyncadd [#allocation3], 4294967040 }
  0x1b   :  { %176 = dma.done.wait [#allocation6], 256  }
  0x1c   :  { %177 = vsyncadd [#allocation6], 4294967040  ;;  %v64_v0 = vld [vmem:[#allocation5] sm:$0xff]  ;;  %v65_v1 = vld [vmem:[#allocation5 + $0x8] sm:$0xff]  ;;  %s184_s0 = smov [#allocation7]  }
  0x1d   :  { %v66_v2 = vmax.f32 %v64_v0, 0.0  ;;  %v67_v3 = vmax.f32 %v65_v1, 0.0  ;;  %v58_v6 = vld [vmem:[#allocation2] sm:$0xff]  ;;  %v59_v7 = vld [vmem:[#allocation2 + $0x8] sm:$0xff]  ;;  %s90_s1 = sshll.u32 %s184_s0, 4  ;;  %s91_s1 = int_to_ptr.vmem [resolvable:$true] %s90_s1 }
  0x1e   :  { %v60_v8 = vmax.f32 %v58_v6, 0.0  ;;  %v61_v9 = vmax.f32 %v59_v7, 0.0  ;;  %s154_s21 = scalar_lea.vmem %s91_s1, 128  ;;  %p159_p11 = scmp.lt.s32.totalorder %s91_s1, %s91_s1 }
  0x1f   :  { %v68_v4 = vadd.f32 1e-10, %v66_v2  ;;  %v69_v5 = vadd.f32 1e-10, %v67_v3  ;;  %p155_p10 = scmp.ne.s32.totalorder %s91_s1, %s154_s21  ;;  %p160_p12 = scmp.lt.s32.totalorder %s154_s21, %s154_s21 }
  0x20   :  { %v62_v10 = vadd.f32 1e-10, %v60_v8  ;;  %v63_v11 = vadd.f32 1e-10, %v61_v9 }
  0x21   :  { %106 = vrcp.f32 %v68_v4  ;;  %p161_p13 = por %p160_p12, %p159_p11 }
  0x22   :  { %108 = vrcp.f32 %v69_v5 }
  0x23   :  { %p162_p0 = pnand %p161_p13, %p155_p10 }
  0x2e   :  { %v107_v12 = vpop.eup %106 }
  0x2f   :  { %v109_v13 = vpop.eup %108  ;;  %v71_v14 = vmul.f32 %v107_v12, %v62_v10 }
  0x30   :  { %v73_v15 = vmul.f32 %v109_v13, %v63_v11 }
  0x31   :  { %110 = vlog2.f32 %v71_v14 }
  0x32   :  { %112 = vlog2.f32 %v73_v15 }
  0x3e   :  { %v111_v16 = vpop.eup %110 }
  0x3f   :  { %v113_v17 = vpop.eup %112  ;;  %v75_v18 = vmul.f32 0.6931472, %v111_v16 }
  0x40   :  { %v77_v19 = vmul.f32 0.6931472, %v113_v17 }
  0x41   :  { %v78_v20 = vmul.f32 %v75_v18, %v75_v18 }
  0x42   :  { %v79_v21 = vmul.f32 %v77_v19, %v77_v19 }
  0x44   :  { %v80_v22 = vadd.f32 %v79_v21, %v78_v20 }
  0x46   :  { %83 = vst [vmem:[#allocation7] sm:$0xff] %v80_v22 }
  0x47   :  { %165 = shalt.err (!%p162_p0)
}
  0x48   :  { %93 = dma.vmem_to_hbm [thread:$0]  %s91_s1, 128, %s211_s2, [#allocation4]  }
  0x49   :  { %178 = dma.done.wait [#allocation4], 128  }
  0x4a   :  { %179 = vsyncadd [#allocation4], 4294967168 }
  0x4b   :  { %97 = vsyncpa [#allocation3], 1 }
  0x4c   :  { %98 = vsyncpa [#allocation6], 1 }
  0x4d   :  { %99 = vsyncpa [#allocation4], 1 }

</bundles_post_ra>
